<compile_context>
chip_gen: v5e
topology: v5e:2x2
jax: 0.10.0
libtpu: 0.0.40
codegen_flags: <defaults>
</compile_context>

<pallas_src>
import functools
import math

import jax
import jax.numpy as jnp
from jax.experimental import pallas as pl
from jax.experimental.pallas import tpu as pltpu


# ----------------------------------------------------------------------------
# helpers
# ----------------------------------------------------------------------------
def _vmem_capacity_bytes():
    try:
        cap = int(pltpu.get_tpu_info().vmem_capacity_bytes)
        if cap > 0:
            return cap
    except Exception:
        pass
    return 64 << 20  # conservative (v7x-sized) fallback


def _vmem_limit(est_bytes, cap):
    ceiling = max(32 << 20, (cap * 3) // 4)          # ~96 MiB on 128 MiB parts, ~48 MiB on v7x
    return int(max(32 << 20, min(int(est_bytes) + (16 << 20), ceiling)))


def _largest_divisor_multiple(total, target, multiple):
    """Largest divisor of `total` that is a multiple of `multiple` and <= max(target, multiple)."""
    best = None
    top = min(total, max(target, multiple))
    for d in range(multiple, top + 1, multiple):
        if total % d == 0:
            best = d
    return best


def _row_tile_candidates(R):
    cands = set()
    for target in (2048, 1024, 512, 256, 128):
        for m in (128, 16, 8):                        # prefer lane/sublane-friendly tiles
            t = _largest_divisor_multiple(R, target, m)
            if t is not None:
                cands.add(t)
                break
    if not cands:
        cands.add(R)
    return sorted(cands, reverse=True)


def _col_tile_candidates(I):
    cands = [d for d in range(I, 0, -1) if I % d == 0 and d % 128 == 0]
    return cands if cands else [I]


def _pick_head_group(nh, hd, target=256):
    """Smallest divisor G of nh such that G*hd >= target (fills the MXU); else all heads."""
    for g in range(1, nh + 1):
        if nh % g == 0 and g * hd >= target:
            return g
    return nh


def _attn_est(S, H, ghd):
    return (4 * S * H * 4                              # x + out blocks, double-buffered f32
            + 2 * (3 * H * ghd + ghd * H) * 2          # wqkv + wao blocks, double-buffered bf16
            + 2 * (3 * ghd + 3 * H) * 4                # bias / LN parameter blocks
            + S * H * 2                                # cached bf16 input scratch
            + (6 * S * ghd + 3 * S * S + 2 * S * H) * 4)  # in-kernel temporaries


def _ffn_est(tR, tI, H):
    return (4 * tR * H * 4                             # x + out blocks, double-buffered f32
            + 4 * H * tI * 2                           # wi + wo blocks, double-buffered bf16
            + 2 * (tI + 3 * H) * 4                     # bias / LN parameter blocks
            + 2 * tR * tI * 4                          # intermediate temporaries
            + 2 * tR * H * 4)                          # cast / contribution temporaries


# ----------------------------------------------------------------------------
# Kernel 1: self-attention + output dense + residual + LayerNorm1
#   grid = (batch, head_groups); head-group axis accumulates into out_ref.
# ----------------------------------------------------------------------------
def _attention_kernel(
    x_ref,                                  # [1, S, H]        f32
    wqkv_ref,                               # [1, H, 3*G*hd]   bf16
    bqkv_ref,                               # [1, 1, 3*G*hd]   f32
    wao_ref,                                # [1, G*hd, H]     bf16
    bao_ref, g1_ref, b1_ref,                # [1, H]           f32
    out_ref,                                # [1, S, H]        f32 (resident across groups)
    xb_ref,                                 # [S, H]           bf16 scratch (cached cast)
    *, eps, inv_sqrt_d, heads_per_group, head_dim,
):
    g = pl.program_id(1)
    G, hd = heads_per_group, head_dim
    ghd = G * hd

    @pl.when(g == 0)
    def _cache_input():
        xb_ref[...] = x_ref[0].astype(jnp.bfloat16)

    xb = xb_ref[...]                                                  # [S, H] bf16

    # --- fused Q/K/V projection for this head group (one wide MXU matmul) ----
    qkv = (jnp.dot(xb, wqkv_ref[0], preferred_element_type=jnp.float32)
           + bqkv_ref[0])                                             # [S, 3*G*hd] f32
    q_all = qkv[:, 0:ghd]
    k_all = qkv[:, ghd:2 * ghd].astype(jnp.bfloat16)
    v_all = qkv[:, 2 * ghd:3 * ghd].astype(jnp.bfloat16)

    # --- per-head scaled dot-product attention (small unrolled loop) ---------
    ctx_slices = []
    for i in range(G):
        qi = q_all[:, i * hd:(i + 1) * hd].astype(jnp.bfloat16)
        ki = k_all[:, i * hd:(i + 1) * hd]
        vi = v_all[:, i * hd:(i + 1) * hd]
        s = jax.lax.dot_general(
            qi, ki, dimension_numbers=(((1,), (1,)), ((), ())),
            preferred_element_type=jnp.float32) * inv_sqrt_d          # [S, S] f32
        s = s - jnp.max(s, axis=-1, keepdims=True)
        p = jnp.exp(s)
        probs = p * pl.reciprocal(jnp.sum(p, axis=-1, keepdims=True), approx=True)
        ctx_slices.append(jnp.dot(probs.astype(jnp.bfloat16), vi,
                                  preferred_element_type=jnp.float32))  # [S, hd]
    ctx = ctx_slices[0] if G == 1 else jnp.concatenate(ctx_slices, axis=-1)  # [S, G*hd]

    # --- this group's slice of the output projection, accumulated into out ---
    contrib = jnp.dot(ctx.astype(jnp.bfloat16), wao_ref[0],
                      preferred_element_type=jnp.float32)             # [S, H] f32

    @pl.when(g == 0)
    def _set():
        out_ref[0] = contrib

    @pl.when(g > 0)
    def _accumulate():
        out_ref[0] = out_ref[0] + contrib

    # --- last group: bias + residual + LayerNorm1 ------------------------------
    @pl.when(g == pl.num_programs(1) - 1)
    def _finalize():
        x = x_ref[0]
        attn = out_ref[0] + bao_ref[...] + x
        mu = jnp.mean(attn, axis=-1, keepdims=True)
        var = jnp.mean((attn - mu) ** 2, axis=-1, keepdims=True)
        out_ref[0] = ((attn - mu) * jax.lax.rsqrt(var + eps)
                      * g1_ref[...] + b1_ref[...]).astype(out_ref.dtype)


# ----------------------------------------------------------------------------
# Kernel 2: GELU MLP + residual + LayerNorm2
#   grid = (row_tiles, intermediate_tiles); intermediate axis accumulates into
#   out_ref (f32, resident).  When tI == I the weights are resident and the
#   reduction axis has a single step.
# ----------------------------------------------------------------------------
def _ffn_kernel(
    x_ref,                                  # [tR, H]  f32  (LayerNorm1 output rows)
    wi_ref, bi_ref,                         # [H, tI] bf16 / [1, tI] f32
    wo_ref,                                 # [tI, H] bf16
    bo_ref, g2_ref, b2_ref,                 # [1, H]  f32
    out_ref,                                # [tR, H] f32  (resident across j)
    *, eps,
):
    j = pl.program_id(1)
    x = x_ref[...]
    xb = x.astype(jnp.bfloat16)

    inter = (jnp.dot(xb, wi_ref[...], preferred_element_type=jnp.float32)
             + bi_ref[...])
    # exact (erf) GELU in f32, matching torch.nn.GELU's default
    inter = 0.5 * inter * (1.0 + jax.lax.erf(inter * (1.0 / math.sqrt(2.0))))
    contrib = jnp.dot(inter.astype(jnp.bfloat16), wo_ref[...],
                      preferred_element_type=jnp.float32)

    @pl.when(j == 0)
    def _set():
        out_ref[...] = contrib

    @pl.when(j > 0)
    def _accumulate():
        out_ref[...] = out_ref[...] + contrib

    @pl.when(j == pl.num_programs(1) - 1)
    def _finalize():
        res = out_ref[...] + bo_ref[...] + x
        mu = jnp.mean(res, axis=-1, keepdims=True)
        var = jnp.mean((res - mu) ** 2, axis=-1, keepdims=True)
        out_ref[...] = ((res - mu) * jax.lax.rsqrt(var + eps)
                        * g2_ref[...] + b2_ref[...]).astype(out_ref.dtype)


# ----------------------------------------------------------------------------
# Wrappers
# ----------------------------------------------------------------------------
def _attention_block(x, p, *, num_heads, eps=1e-12):
    B, S, H = x.shape
    nh = num_heads
    hd = H // nh
    G = _pick_head_group(nh, hd, target=256)   # fill MXU lanes / contraction depth
    nG = nh // G
    ghd = G * hd
    bf16 = jnp.bfloat16

    # Host-side one-off repack: fuse Q/K/V weights per head group.
    def group_proj(w):   # [H, H] -> [nG, H, G*hd]
        return w.reshape(H, nG, ghd).transpose(1, 0, 2)

    def group_bias(b):   # [1, H] -> [nG, 1, G*hd]
        return b.reshape(nG, 1, ghd)

    wqkv = jnp.concatenate(
        [group_proj(p["wq"]), group_proj(p["wk"]), group_proj(p["wv"])],
        axis=2).astype(bf16)                                  # [nG, H, 3*G*hd]
    bqkv = jnp.concatenate(
        [group_bias(p["bq"]), group_bias(p["bk"]), group_bias(p["bv"])],
        axis=2)                                               # [nG, 1, 3*G*hd]
    wao = p["wao"].reshape(nG, ghd, H).astype(bf16)           # [nG, G*hd, H]

    row_spec = pl.BlockSpec((1, H), lambda b, g: (0, 0))
    cap = _vmem_capacity_bytes()
    vmem_bytes = _vmem_limit(_attn_est(S, H, ghd), cap)

    kernel = functools.partial(
        _attention_kernel, eps=eps, inv_sqrt_d=1.0 / math.sqrt(hd),
        heads_per_group=G, head_dim=hd)

    return pl.pallas_call(
        kernel,
        out_shape=jax.ShapeDtypeStruct((B, S, H), x.dtype),
        grid_spec=pltpu.PrefetchScalarGridSpec(
            num_scalar_prefetch=0,
            grid=(B, nG),
            in_specs=[
                pl.BlockSpec((1, S, H), lambda b, g: (b, 0, 0)),          # x
                pl.BlockSpec((1, H, 3 * ghd), lambda b, g: (g, 0, 0)),    # wqkv
                pl.BlockSpec((1, 1, 3 * ghd), lambda b, g: (g, 0, 0)),    # bqkv
                pl.BlockSpec((1, ghd, H), lambda b, g: (g, 0, 0)),        # wao
                row_spec, row_spec, row_spec,                             # bao, g1, b1
            ],
            out_specs=pl.BlockSpec((1, S, H), lambda b, g: (b, 0, 0)),
            scratch_shapes=[pltpu.VMEM((S, H), jnp.bfloat16)],            # cached bf16 input
        ),
        compiler_params=pltpu.CompilerParams(
            dimension_semantics=("parallel", "arbitrary"),
            vmem_limit_bytes=vmem_bytes),
    )(x, wqkv, bqkv, wao, p["bao"], p["g1"], p["b1"])
    # TODO(synk): at B==1 on v7x only one TensorCore is used by this kernel
    # (the FFN's row axis already parallelizes); a query-block axis would fix it.


def _ffn_block(x, p, *, eps=1e-12):
    B, S, H = x.shape
    I = p["wi"].shape[1]
    R = B * S

    cap = _vmem_capacity_bytes()
    budget = max(24 << 20, int(cap * 0.55))

    # Prefer the full intermediate width (resident wi/wo, 1 reduction step),
    # then the biggest row tile that fits the generation-aware VMEM budget.
    tR_cands = _row_tile_candidates(R)
    tI_cands = _col_tile_candidates(I)
    tR, tI = tR_cands[-1], tI_cands[-1]
    done = False
    for cand_i in tI_cands:
        for cand_r in tR_cands:
            if _ffn_est(cand_r, cand_i, H) <= budget:
                tR, tI = cand_r, cand_i
                done = True
                break
        if done:
            break

    x2 = x.reshape(R, H)
    wi = p["wi"].astype(jnp.bfloat16)
    wo = p["wo"].astype(jnp.bfloat16)
    vmem_bytes = _vmem_limit(_ffn_est(tR, tI, H), cap)

    kernel = functools.partial(_ffn_kernel, eps=eps)
    out = pl.pallas_call(
        kernel,
        out_shape=jax.ShapeDtypeStruct((R, H), x.dtype),
        grid_spec=pltpu.PrefetchScalarGridSpec(
            num_scalar_prefetch=0,
            grid=(R // tR, I // tI),
            in_specs=[
                pl.BlockSpec((tR, H), lambda r, j: (r, 0)),    # ln1 rows
                pl.BlockSpec((H, tI), lambda r, j: (0, j)),    # wi (resident when tI == I)
                pl.BlockSpec((1, tI), lambda r, j: (0, j)),    # bi
                pl.BlockSpec((tI, H), lambda r, j: (j, 0)),    # wo (resident when tI == I)
                pl.BlockSpec((1, H), lambda r, j: (0, 0)),     # bo
                pl.BlockSpec((1, H), lambda r, j: (0, 0)),     # g2
                pl.BlockSpec((1, H), lambda r, j: (0, 0)),     # b2
            ],
            out_specs=pl.BlockSpec((tR, H), lambda r, j: (r, 0)),
        ),
        compiler_params=pltpu.CompilerParams(
            dimension_semantics=("parallel", "arbitrary"),
            vmem_limit_bytes=vmem_bytes),
    )(x2, wi, p["bi"], wo, p["bo"], p["g2"], p["b2"])
    return out.reshape(B, S, H)


def bert_layer_pallas(x, params, *, num_heads):
    attn = _attention_block(x, params, num_heads=num_heads)
    return _ffn_block(attn, params)


def bert_encoder_pallas(x, layer_params, *, num_heads):
    # attention_mask=None path of the encoder stack (dropout = identity).
    all_hidden = []
    hidden = x
    for params in layer_params:
        hidden = bert_layer_pallas(hidden, params, num_heads=num_heads)
        all_hidden.append(hidden)
    return hidden, all_hidden


# ----------------------------------------------------------------------------
# Deterministic parameter init + pure-JAX f32 reference (sanity check)
# ----------------------------------------------------------------------------
def make_layer_params(key, H, I):
    ks = jax.random.split(key, 16)
    n = lambda k, shape: (jax.random.normal(k, shape, jnp.float32) * 0.02)
    return {
        "wq": n(ks[0], (H, H)),  "bq": n(ks[1], (1, H)),
        "wk": n(ks[2], (H, H)),  "bk": n(ks[3], (1, H)),
        "wv": n(ks[4], (H, H)),  "bv": n(ks[5], (1, H)),
        "wao": n(ks[6], (H, H)), "bao": n(ks[7], (1, H)),
        "g1": jnp.ones((1, H), jnp.float32), "b1": jnp.zeros((1, H), jnp.float32),
        "wi": n(ks[8], (H, I)),  "bi": n(ks[9], (1, I)),
        "wo": n(ks[10], (I, H)), "bo": n(ks[11], (1, H)),
        "g2": jnp.ones((1, H), jnp.float32), "b2": jnp.zeros((1, H), jnp.float32),
    }


def bert_layer_ref(x, p, *, num_heads):
    B, S, H = x.shape
    hd = H // num_heads
    q = x @ p["wq"] + p["bq"]
    k = x @ p["wk"] + p["bk"]
    v = x @ p["wv"] + p["bv"]

    def split(t):  # [B,S,H] -> [B,nh,S,hd]
        return t.reshape(B, S, num_heads, hd).transpose(0, 2, 1, 3)

    Q, K, V = split(q), split(k), split(v)
    scores = jnp.einsum("bhqd,bhkd->bhqk", Q, K) / math.sqrt(hd)
    probs = jax.nn.softmax(scores, axis=-1)
    ctx = jnp.einsum("bhqk,bhkd->bhqd", probs, V)
    ctx = ctx.transpose(0, 2, 1, 3).reshape(B, S, H)

    def ln(y, g, b):
        mu = jnp.mean(y, axis=-1, keepdims=True)
        var = jnp.mean((y - mu) ** 2, axis=-1, keepdims=True)
        return (y - mu) / jnp.sqrt(var + 1e-12) * g + b

    attn = ln(ctx @ p["wao"] + p["bao"] + x, p["g1"], p["b1"])
    inter = attn @ p["wi"] + p["bi"]
    inter = 0.5 * inter * (1.0 + jax.lax.erf(inter / math.sqrt(2.0)))
    return ln(inter @ p["wo"] + p["bo"] + attn, p["g2"], p["b2"])


if __name__ == "__main__":
    # Small config: hidden=32, heads=4, intermediate=128, layers=2, batch=2, seq=8
    B, S, H, NH, I, L = 2, 8, 32, 4, 128, 2

    key = jax.random.PRNGKey(0)
    k_x, k_p = jax.random.split(key)
    x = jax.random.normal(k_x, (B, S, H), jnp.float32)
    layer_keys = jax.random.split(k_p, L)
    layer_params = [make_layer_params(layer_keys[i], H, I) for i in range(L)]

    final, all_hidden = bert_encoder_pallas(x, layer_params, num_heads=NH)
    final = jax.block_until_ready(final)
    all_hidden = [jax.block_until_ready(h) for h in all_hidden]

    # sanity check vs. pure-JAX f32 reference (bf16 MXU operands => looser tol)
    ref = x
    for p in layer_params:
        ref = bert_layer_ref(ref, p, num_heads=NH)
    assert final.shape == (B, S, H) and len(all_hidden) == L
    assert jnp.allclose(final, ref, atol=5e-2, rtol=5e-2), "mismatch vs reference"

    print("KERNEL_OK")
</pallas_src>

<mosaic_0001>
module attributes {stable_mosaic.version = 11 : i64} {
  func.func @_attention_kernel(%arg0: i32, %arg1: i32, %arg2: memref<1x8x32xf32, #tpu.memory_space<vmem>>, %arg3: memref<1x32x96xbf16, #tpu.memory_space<vmem>>, %arg4: memref<1x1x96xf32, #tpu.memory_space<vmem>>, %arg5: memref<1x32x32xbf16, #tpu.memory_space<vmem>>, %arg6: memref<1x32xf32, #tpu.memory_space<vmem>>, %arg7: memref<1x32xf32, #tpu.memory_space<vmem>>, %arg8: memref<1x32xf32, #tpu.memory_space<vmem>>, %arg9: memref<1x8x32xf32, #tpu.memory_space<vmem>>, %arg10: memref<8x32xbf16, #tpu.memory_space<vmem>>) attributes {dimension_semantics = [#tpu.dimension_semantics<parallel>, #tpu.dimension_semantics<arbitrary>], iteration_bounds = array<i64: 2, 1>, scalar_prefetch = 0 : i64, scratch_operands = 1 : i64, tpu.core_type = #tpu.core_type<tc>, window_params = [{transform_indices = @transform_0, window_bounds = array<i64: 1, 8, 32>}, {transform_indices = @transform_1, window_bounds = array<i64: 1, 32, 96>}, {transform_indices = @transform_2, window_bounds = array<i64: 1, 1, 96>}, {transform_indices = @transform_3, window_bounds = array<i64: 1, 32, 32>}, {pipeline_mode = #tpu.pipeline_mode<synchronous>, transform_indices = @transform_4, window_bounds = array<i64: 1, 32>}, {pipeline_mode = #tpu.pipeline_mode<synchronous>, transform_indices = @transform_5, window_bounds = array<i64: 1, 32>}, {pipeline_mode = #tpu.pipeline_mode<synchronous>, transform_indices = @transform_6, window_bounds = array<i64: 1, 32>}, {transform_indices = @transform_7, window_bounds = array<i64: 1, 8, 32>}]} {
    %c0_i32 = arith.constant 0 : i32
    %0 = arith.cmpi eq, %arg1, %c0_i32 : i32
    %1 = arith.extui %0 : i1 to i32
    %c0_i32_0 = arith.constant 0 : i32
    %2 = arith.cmpi ne, %1, %c0_i32_0 : i32
    scf.if %2 {
      %c0_38 = arith.constant 0 : index
      %c0_39 = arith.constant 0 : index
      %c0_40 = arith.constant 0 : index
      %106 = vector.load %arg2[%c0_38, %c0_39, %c0_40] : memref<1x8x32xf32, #tpu.memory_space<vmem>>, vector<1x8x32xf32>
      %107 = vector.shape_cast %106 : vector<1x8x32xf32> to vector<8x32xf32>
      %108 = arith.truncf %107 : vector<8x32xf32> to vector<8x32xbf16>
      %c0_41 = arith.constant 0 : index
      %c0_42 = arith.constant 0 : index
      %109 = vector.load %arg10[%c0_41, %c0_42] : memref<8x32xbf16, #tpu.memory_space<vmem>>, vector<8x32xbf16>
      tpu.vector_store %arg10[%c0_41, %c0_42], %108 {strides = array<i32>} : memref<8x32xbf16, #tpu.memory_space<vmem>>, vector<8x32xbf16>,
    } else {
    }
    %c0 = arith.constant 0 : index
    %c0_1 = arith.constant 0 : index
    %3 = vector.load %arg10[%c0, %c0_1] : memref<8x32xbf16, #tpu.memory_space<vmem>>, vector<8x32xbf16>
    %c0_2 = arith.constant 0 : index
    %c0_3 = arith.constant 0 : index
    %c0_4 = arith.constant 0 : index
    %4 = vector.load %arg3[%c0_2, %c0_3, %c0_4] : memref<1x32x96xbf16, #tpu.memory_space<vmem>>, vector<1x32x96xbf16>
    %5 = vector.shape_cast %4 : vector<1x32x96xbf16> to vector<32x96xbf16>
    %cst = arith.constant dense<0.000000e+00> : vector<8x96xf32>
    %6 = tpu.matmul %3, %5, %cst {dimension_numbers = #tpu.dot_dimension_numbers<[1], [0], [0], [1], [0, 0, 1, 1], [], []>} : vector<8x32xbf16>, vector<32x96xbf16>, vector<8x96xf32> -> vector<8x96xf32>
    %c0_5 = arith.constant 0 : index
    %c0_6 = arith.constant 0 : index
    %c0_7 = arith.constant 0 : index
    %7 = vector.load %arg4[%c0_5, %c0_6, %c0_7] : memref<1x1x96xf32, #tpu.memory_space<vmem>>, vector<1x1x96xf32>
    %8 = vector.shape_cast %7 : vector<1x1x96xf32> to vector<1x96xf32>
    %9 = vector.broadcast %8 : vector<1x96xf32> to vector<8x96xf32>
    %10 = arith.addf %6, %9 : vector<8x96xf32>
    %11 = vector.extract_strided_slice %10 {offsets = [0, 0], sizes = [8, 32], strides = [1, 1]} : vector<8x96xf32> to vector<8x32xf32>
    %12 = vector.extract_strided_slice %10 {offsets = [0, 32], sizes = [8, 32], strides = [1, 1]} : vector<8x96xf32> to vector<8x32xf32>
    %13 = arith.truncf %12 : vector<8x32xf32> to vector<8x32xbf16>
    %14 = vector.extract_strided_slice %10 {offsets = [0, 64], sizes = [8, 32], strides = [1, 1]} : vector<8x96xf32> to vector<8x32xf32>
    %15 = arith.truncf %14 : vector<8x32xf32> to vector<8x32xbf16>
    %16 = vector.extract_strided_slice %11 {offsets = [0, 0], sizes = [8, 8], strides = [1, 1]} : vector<8x32xf32> to vector<8x8xf32>
    %17 = arith.truncf %16 : vector<8x8xf32> to vector<8x8xbf16>
    %18 = vector.extract_strided_slice %13 {offsets = [0, 0], sizes = [8, 8], strides = [1, 1]} : vector<8x32xbf16> to vector<8x8xbf16>
    %19 = vector.extract_strided_slice %15 {offsets = [0, 0], sizes = [8, 8], strides = [1, 1]} : vector<8x32xbf16> to vector<8x8xbf16>
    %cst_8 = arith.constant dense<0.000000e+00> : vector<8x8xf32>
    %20 = tpu.matmul %17, %18, %cst_8 {dimension_numbers = #tpu.dot_dimension_numbers<[1], [1], [0], [0], [0, 0, 1, 0], [], []>} : vector<8x8xbf16>, vector<8x8xbf16>, vector<8x8xf32> -> vector<8x8xf32>
    %cst_9 = arith.constant 0.353553385 : f32
    %21 = vector.broadcast %cst_9 : f32 to vector<8x8xf32>
    %22 = arith.mulf %20, %21 : vector<8x8xf32>
    %cst_10 = arith.constant dense<0xFF800000> : vector<8xf32>
    %23 = vector.multi_reduction <maximumf>, %22, %cst_10 [1] : vector<8x8xf32> to vector<8xf32>
    %24 = vector.shape_cast %23 : vector<8xf32> to vector<8x1xf32>
    %25 = vector.broadcast %24 : vector<8x1xf32> to vector<8x8xf32>
    %26 = arith.subf %22, %25 : vector<8x8xf32>
    %27 = math.exp %26 : vector<8x8xf32>
    %cst_11 = arith.constant dense<0.000000e+00> : vector<8xf32>
    %28 = vector.multi_reduction <add>, %27, %cst_11 [1] : vector<8x8xf32> to vector<8xf32>
    %29 = vector.shape_cast %28 : vector<8xf32> to vector<8x1xf32>
    %30 = tpu.reciprocal %29 {approx = true} : vector<8x1xf32> -> vector<8x1xf32>
    %31 = vector.broadcast %30 : vector<8x1xf32> to vector<8x8xf32>
    %32 = arith.mulf %27, %31 : vector<8x8xf32>
    %33 = arith.truncf %32 : vector<8x8xf32> to vector<8x8xbf16>
    %cst_12 = arith.constant dense<0.000000e+00> : vector<8x8xf32>
    %34 = tpu.matmul %33, %19, %cst_12 {dimension_numbers = #tpu.dot_dimension_numbers<[1], [0], [0], [1], [0, 0, 1, 1], [], []>} : vector<8x8xbf16>, vector<8x8xbf16>, vector<8x8xf32> -> vector<8x8xf32>
    %35 = vector.extract_strided_slice %11 {offsets = [0, 8], sizes = [8, 8], strides = [1, 1]} : vector<8x32xf32> to vector<8x8xf32>
    %36 = arith.truncf %35 : vector<8x8xf32> to vector<8x8xbf16>
    %37 = vector.extract_strided_slice %13 {offsets = [0, 8], sizes = [8, 8], strides = [1, 1]} : vector<8x32xbf16> to vector<8x8xbf16>
    %38 = vector.extract_strided_slice %15 {offsets = [0, 8], sizes = [8, 8], strides = [1, 1]} : vector<8x32xbf16> to vector<8x8xbf16>
    %cst_13 = arith.constant dense<0.000000e+00> : vector<8x8xf32>
    %39 = tpu.matmul %36, %37, %cst_13 {dimension_numbers = #tpu.dot_dimension_numbers<[1], [1], [0], [0], [0, 0, 1, 0], [], []>} : vector<8x8xbf16>, vector<8x8xbf16>, vector<8x8xf32> -> vector<8x8xf32>
    %cst_14 = arith.constant 0.353553385 : f32
    %40 = vector.broadcast %cst_14 : f32 to vector<8x8xf32>
    %41 = arith.mulf %39, %40 : vector<8x8xf32>
    %cst_15 = arith.constant dense<0xFF800000> : vector<8xf32>
    %42 = vector.multi_reduction <maximumf>, %41, %cst_15 [1] : vector<8x8xf32> to vector<8xf32>
    %43 = vector.shape_cast %42 : vector<8xf32> to vector<8x1xf32>
    %44 = vector.broadcast %43 : vector<8x1xf32> to vector<8x8xf32>
    %45 = arith.subf %41, %44 : vector<8x8xf32>
    %46 = math.exp %45 : vector<8x8xf32>
    %cst_16 = arith.constant dense<0.000000e+00> : vector<8xf32>
    %47 = vector.multi_reduction <add>, %46, %cst_16 [1] : vector<8x8xf32> to vector<8xf32>
    %48 = vector.shape_cast %47 : vector<8xf32> to vector<8x1xf32>
    %49 = tpu.reciprocal %48 {approx = true} : vector<8x1xf32> -> vector<8x1xf32>
    %50 = vector.broadcast %49 : vector<8x1xf32> to vector<8x8xf32>
    %51 = arith.mulf %46, %50 : vector<8x8xf32>
    %52 = arith.truncf %51 : vector<8x8xf32> to vector<8x8xbf16>
    %cst_17 = arith.constant dense<0.000000e+00> : vector<8x8xf32>
    %53 = tpu.matmul %52, %38, %cst_17 {dimension_numbers = #tpu.dot_dimension_numbers<[1], [0], [0], [1], [0, 0, 1, 1], [], []>} : vector<8x8xbf16>, vector<8x8xbf16>, vector<8x8xf32> -> vector<8x8xf32>
    %54 = vector.extract_strided_slice %11 {offsets = [0, 16], sizes = [8, 8], strides = [1, 1]} : vector<8x32xf32> to vector<8x8xf32>
    %55 = arith.truncf %54 : vector<8x8xf32> to vector<8x8xbf16>
    %56 = vector.extract_strided_slice %13 {offsets = [0, 16], sizes = [8, 8], strides = [1, 1]} : vector<8x32xbf16> to vector<8x8xbf16>
    %57 = vector.extract_strided_slice %15 {offsets = [0, 16], sizes = [8, 8], strides = [1, 1]} : vector<8x32xbf16> to vector<8x8xbf16>
    %cst_18 = arith.constant dense<0.000000e+00> : vector<8x8xf32>
    %58 = tpu.matmul %55, %56, %cst_18 {dimension_numbers = #tpu.dot_dimension_numbers<[1], [1], [0], [0], [0, 0, 1, 0], [], []>} : vector<8x8xbf16>, vector<8x8xbf16>, vector<8x8xf32> -> vector<8x8xf32>
    %cst_19 = arith.constant 0.353553385 : f32
    %59 = vector.broadcast %cst_19 : f32 to vector<8x8xf32>
    %60 = arith.mulf %58, %59 : vector<8x8xf32>
    %cst_20 = arith.constant dense<0xFF800000> : vector<8xf32>
    %61 = vector.multi_reduction <maximumf>, %60, %cst_20 [1] : vector<8x8xf32> to vector<8xf32>
    %62 = vector.shape_cast %61 : vector<8xf32> to vector<8x1xf32>
    %63 = vector.broadcast %62 : vector<8x1xf32> to vector<8x8xf32>
    %64 = arith.subf %60, %63 : vector<8x8xf32>
    %65 = math.exp %64 : vector<8x8xf32>
    %cst_21 = arith.constant dense<0.000000e+00> : vector<8xf32>
    %66 = vector.multi_reduction <add>, %65, %cst_21 [1] : vector<8x8xf32> to vector<8xf32>
    %67 = vector.shape_cast %66 : vector<8xf32> to vector<8x1xf32>
    %68 = tpu.reciprocal %67 {approx = true} : vector<8x1xf32> -> vector<8x1xf32>
    %69 = vector.broadcast %68 : vector<8x1xf32> to vector<8x8xf32>
    %70 = arith.mulf %65, %69 : vector<8x8xf32>
    %71 = arith.truncf %70 : vector<8x8xf32> to vector<8x8xbf16>
    %cst_22 = arith.constant dense<0.000000e+00> : vector<8x8xf32>
    %72 = tpu.matmul %71, %57, %cst_22 {dimension_numbers = #tpu.dot_dimension_numbers<[1], [0], [0], [1], [0, 0, 1, 1], [], []>} : vector<8x8xbf16>, vector<8x8xbf16>, vector<8x8xf32> -> vector<8x8xf32>
    %73 = vector.extract_strided_slice %11 {offsets = [0, 24], sizes = [8, 8], strides = [1, 1]} : vector<8x32xf32> to vector<8x8xf32>
    %74 = arith.truncf %73 : vector<8x8xf32> to vector<8x8xbf16>
    %75 = vector.extract_strided_slice %13 {offsets = [0, 24], sizes = [8, 8], strides = [1, 1]} : vector<8x32xbf16> to vector<8x8xbf16>
    %76 = vector.extract_strided_slice %15 {offsets = [0, 24], sizes = [8, 8], strides = [1, 1]} : vector<8x32xbf16> to vector<8x8xbf16>
    %cst_23 = arith.constant dense<0.000000e+00> : vector<8x8xf32>
    %77 = tpu.matmul %74, %75, %cst_23 {dimension_numbers = #tpu.dot_dimension_numbers<[1], [1], [0], [0], [0, 0, 1, 0], [], []>} : vector<8x8xbf16>, vector<8x8xbf16>, vector<8x8xf32> -> vector<8x8xf32>
    %cst_24 = arith.constant 0.353553385 : f32
    %78 = vector.broadcast %cst_24 : f32 to vector<8x8xf32>
    %79 = arith.mulf %77, %78 : vector<8x8xf32>
    %cst_25 = arith.constant dense<0xFF800000> : vector<8xf32>
    %80 = vector.multi_reduction <maximumf>, %79, %cst_25 [1] : vector<8x8xf32> to vector<8xf32>
    %81 = vector.shape_cast %80 : vector<8xf32> to vector<8x1xf32>
    %82 = vector.broadcast %81 : vector<8x1xf32> to vector<8x8xf32>
    %83 = arith.subf %79, %82 : vector<8x8xf32>
    %84 = math.exp %83 : vector<8x8xf32>
    %cst_26 = arith.constant dense<0.000000e+00> : vector<8xf32>
    %85 = vector.multi_reduction <add>, %84, %cst_26 [1] : vector<8x8xf32> to vector<8xf32>
    %86 = vector.shape_cast %85 : vector<8xf32> to vector<8x1xf32>
    %87 = tpu.reciprocal %86 {approx = true} : vector<8x1xf32> -> vector<8x1xf32>
    %88 = vector.broadcast %87 : vector<8x1xf32> to vector<8x8xf32>
    %89 = arith.mulf %84, %88 : vector<8x8xf32>
    %90 = arith.truncf %89 : vector<8x8xf32> to vector<8x8xbf16>
    %cst_27 = arith.constant dense<0.000000e+00> : vector<8x8xf32>
    %91 = tpu.matmul %90, %76, %cst_27 {dimension_numbers = #tpu.dot_dimension_numbers<[1], [0], [0], [1], [0, 0, 1, 1], [], []>} : vector<8x8xbf16>, vector<8x8xbf16>, vector<8x8xf32> -> vector<8x8xf32>
    %92 = tpu.concatenate %34, %53, %72, %91 in 1 : vector<8x8xf32>, vector<8x8xf32>, vector<8x8xf32>, vector<8x8xf32> -> vector<8x32xf32>
    %93 = arith.truncf %92 : vector<8x32xf32> to vector<8x32xbf16>
    %c0_28 = arith.constant 0 : index
    %c0_29 = arith.constant 0 : index
    %c0_30 = arith.constant 0 : index
    %94 = vector.load %arg5[%c0_28, %c0_29, %c0_30] : memref<1x32x32xbf16, #tpu.memory_space<vmem>>, vector<1x32x32xbf16>
    %95 = vector.shape_cast %94 : vector<1x32x32xbf16> to vector<32x32xbf16>
    %cst_31 = arith.constant dense<0.000000e+00> : vector<8x32xf32>
    %96 = tpu.matmul %93, %95, %cst_31 {dimension_numbers = #tpu.dot_dimension_numbers<[1], [0], [0], [1], [0, 0, 1, 1], [], []>} : vector<8x32xbf16>, vector<32x32xbf16>, vector<8x32xf32> -> vector<8x32xf32>
    %c0_i32_32 = arith.constant 0 : i32
    %97 = arith.cmpi eq, %arg1, %c0_i32_32 : i32
    %98 = arith.extui %97 : i1 to i32
    %c0_i32_33 = arith.constant 0 : i32
    %99 = arith.cmpi ne, %98, %c0_i32_33 : i32
    scf.if %99 {
      %c0_38 = arith.constant 0 : index
      %c0_39 = arith.constant 0 : index
      %c0_40 = arith.constant 0 : index
      %106 = vector.load %arg9[%c0_38, %c0_39, %c0_40] : memref<1x8x32xf32, #tpu.memory_space<vmem>>, vector<1x8x32xf32>
      %107 = vector.shape_cast %106 : vector<1x8x32xf32> to vector<8x32xf32>
      %108 = vector.shape_cast %96 : vector<8x32xf32> to vector<1x8x32xf32>
      tpu.vector_store %arg9[%c0_38, %c0_39, %c0_40], %108 {strides = array<i32>} : memref<1x8x32xf32, #tpu.memory_space<vmem>>, vector<1x8x32xf32>,
    } else {
    }
    %c0_i32_34 = arith.constant 0 : i32
    %100 = arith.cmpi sgt, %arg1, %c0_i32_34 : i32
    %101 = arith.extui %100 : i1 to i32
    %c0_i32_35 = arith.constant 0 : i32
    %102 = arith.cmpi ne, %101, %c0_i32_35 : i32
    scf.if %102 {
      %c0_38 = arith.constant 0 : index
      %c0_39 = arith.constant 0 : index
      %c0_40 = arith.constant 0 : index
      %106 = vector.load %arg9[%c0_38, %c0_39, %c0_40] : memref<1x8x32xf32, #tpu.memory_space<vmem>>, vector<1x8x32xf32>
      %107 = vector.shape_cast %106 : vector<1x8x32xf32> to vector<8x32xf32>
      %108 = arith.addf %107, %96 : vector<8x32xf32>
      %c0_41 = arith.constant 0 : index
      %c0_42 = arith.constant 0 : index
      %c0_43 = arith.constant 0 : index
      %109 = vector.load %arg9[%c0_41, %c0_42, %c0_43] : memref<1x8x32xf32, #tpu.memory_space<vmem>>, vector<1x8x32xf32>
      %110 = vector.shape_cast %109 : vector<1x8x32xf32> to vector<8x32xf32>
      %111 = vector.shape_cast %108 : vector<8x32xf32> to vector<1x8x32xf32>
      tpu.vector_store %arg9[%c0_41, %c0_42, %c0_43], %111 {strides = array<i32>} : memref<1x8x32xf32, #tpu.memory_space<vmem>>, vector<1x8x32xf32>,
    } else {
    }
    %c0_i32_36 = arith.constant 0 : i32
    %103 = arith.cmpi eq, %arg1, %c0_i32_36 : i32
    %104 = arith.extui %103 : i1 to i32
    %c0_i32_37 = arith.constant 0 : i32
    %105 = arith.cmpi ne, %104, %c0_i32_37 : i32
    scf.if %105 {
      %c0_38 = arith.constant 0 : index
      %c0_39 = arith.constant 0 : index
      %c0_40 = arith.constant 0 : index
      %106 = vector.load %arg2[%c0_38, %c0_39, %c0_40] : memref<1x8x32xf32, #tpu.memory_space<vmem>>, vector<1x8x32xf32>
      %107 = vector.shape_cast %106 : vector<1x8x32xf32> to vector<8x32xf32>
      %c0_41 = arith.constant 0 : index
      %c0_42 = arith.constant 0 : index
      %c0_43 = arith.constant 0 : index
      %108 = vector.load %arg9[%c0_41, %c0_42, %c0_43] : memref<1x8x32xf32, #tpu.memory_space<vmem>>, vector<1x8x32xf32>
      %109 = vector.shape_cast %108 : vector<1x8x32xf32> to vector<8x32xf32>
      %c0_44 = arith.constant 0 : index
      %c0_45 = arith.constant 0 : index
      %110 = vector.load %arg6[%c0_44, %c0_45] : memref<1x32xf32, #tpu.memory_space<vmem>>, vector<1x32xf32>
      %111 = vector.broadcast %110 : vector<1x32xf32> to vector<8x32xf32>
      %112 = arith.addf %109, %111 : vector<8x32xf32>
      %113 = arith.addf %112, %107 : vector<8x32xf32>
      %cst_46 = arith.constant dense<0.000000e+00> : vector<8xf32>
      %114 = vector.multi_reduction <add>, %113, %cst_46 [1] : vector<8x32xf32> to vector<8xf32>
      %115 = vector.shape_cast %114 : vector<8xf32> to vector<8x1xf32>
      %cst_47 = arith.constant 3.200000e+01 : f32
      %116 = vector.broadcast %cst_47 : f32 to vector<8x1xf32>
      %117 = arith.divf %115, %116 : vector<8x1xf32>
      %118 = vector.broadcast %117 : vector<8x1xf32> to vector<8x32xf32>
      %119 = arith.subf %113, %118 : vector<8x32xf32>
      %120 = arith.mulf %119, %119 : vector<8x32xf32>
      %cst_48 = arith.constant dense<0.000000e+00> : vector<8xf32>
      %121 = vector.multi_reduction <add>, %120, %cst_48 [1] : vector<8x32xf32> to vector<8xf32>
      %122 = vector.shape_cast %121 : vector<8xf32> to vector<8x1xf32>
      %cst_49 = arith.constant 3.200000e+01 : f32
      %123 = vector.broadcast %cst_49 : f32 to vector<8x1xf32>
      %124 = arith.divf %122, %123 : vector<8x1xf32>
      %125 = vector.broadcast %117 : vector<8x1xf32> to vector<8x32xf32>
      %126 = arith.subf %113, %125 : vector<8x32xf32>
      %cst_50 = arith.constant 9.99999996E-13 : f32
      %127 = vector.broadcast %cst_50 : f32 to vector<8x1xf32>
      %128 = arith.addf %124, %127 : vector<8x1xf32>
      %129 = math.rsqrt %128 : vector<8x1xf32>
      %130 = vector.broadcast %129 : vector<8x1xf32> to vector<8x32xf32>
      %131 = arith.mulf %126, %130 : vector<8x32xf32>
      %c0_51 = arith.constant 0 : index
      %c0_52 = arith.constant 0 : index
      %132 = vector.load %arg7[%c0_51, %c0_52] : memref<1x32xf32, #tpu.memory_space<vmem>>, vector<1x32xf32>
      %133 = vector.broadcast %132 : vector<1x32xf32> to vector<8x32xf32>
      %134 = arith.mulf %131, %133 : vector<8x32xf32>
      %c0_53 = arith.constant 0 : index
      %c0_54 = arith.constant 0 : index
      %135 = vector.load %arg8[%c0_53, %c0_54] : memref<1x32xf32, #tpu.memory_space<vmem>>, vector<1x32xf32>
      %136 = vector.broadcast %135 : vector<1x32xf32> to vector<8x32xf32>
      %137 = arith.addf %134, %136 : vector<8x32xf32>
      %c0_55 = arith.constant 0 : index
      %c0_56 = arith.constant 0 : index
      %c0_57 = arith.constant 0 : index
      %138 = vector.load %arg9[%c0_55, %c0_56, %c0_57] : memref<1x8x32xf32, #tpu.memory_space<vmem>>, vector<1x8x32xf32>
      %139 = vector.shape_cast %138 : vector<1x8x32xf32> to vector<8x32xf32>
      %140 = vector.shape_cast %137 : vector<8x32xf32> to vector<1x8x32xf32>
      tpu.vector_store %arg9[%c0_55, %c0_56, %c0_57], %140 {strides = array<i32>} : memref<1x8x32xf32, #tpu.memory_space<vmem>>, vector<1x8x32xf32>,
    } else {
    }
    return
  }
  func.func @transform_0(%arg0: i32, %arg1: i32) -> (i32, i32, i32) {
    %c0_i32 = arith.constant 0 : i32
    %c0_i32_0 = arith.constant 0 : i32
    %c0_i32_1 = arith.constant 0 : i32
    return %arg0, %c0_i32, %c0_i32_0 : i32, i32, i32
  }
  func.func @transform_1(%arg0: i32, %arg1: i32) -> (i32, i32, i32) {
    %c0_i32 = arith.constant 0 : i32
    %c0_i32_0 = arith.constant 0 : i32
    %c0_i32_1 = arith.constant 0 : i32
    return %arg1, %c0_i32, %c0_i32_0 : i32, i32, i32
  }
  func.func @transform_2(%arg0: i32, %arg1: i32) -> (i32, i32, i32) {
    %c0_i32 = arith.constant 0 : i32
    %c0_i32_0 = arith.constant 0 : i32
    %c0_i32_1 = arith.constant 0 : i32
    return %arg1, %c0_i32, %c0_i32_0 : i32, i32, i32
  }
  func.func @transform_3(%arg0: i32, %arg1: i32) -> (i32, i32, i32) {
    %c0_i32 = arith.constant 0 : i32
    %c0_i32_0 = arith.constant 0 : i32
    %c0_i32_1 = arith.constant 0 : i32
    return %arg1, %c0_i32, %c0_i32_0 : i32, i32, i32
  }
  func.func @transform_4(%arg0: i32, %arg1: i32) -> (i32, i32) {
    %c0_i32 = arith.constant 0 : i32
    %c0_i32_0 = arith.constant 0 : i32
    %c0_i32_1 = arith.constant 0 : i32
    return %c0_i32, %c0_i32_0 : i32, i32
  }
  func.func @transform_5(%arg0: i32, %arg1: i32) -> (i32, i32) {
    %c0_i32 = arith.constant 0 : i32
    %c0_i32_0 = arith.constant 0 : i32
    %c0_i32_1 = arith.constant 0 : i32
    return %c0_i32, %c0_i32_0 : i32, i32
  }
  func.func @transform_6(%arg0: i32, %arg1: i32) -> (i32, i32) {
    %c0_i32 = arith.constant 0 : i32
    %c0_i32_0 = arith.constant 0 : i32
    %c0_i32_1 = arith.constant 0 : i32
    return %c0_i32, %c0_i32_0 : i32, i32
  }
  func.func @transform_7(%arg0: i32, %arg1: i32) -> (i32, i32, i32) {
    %c0_i32 = arith.constant 0 : i32
    %c0_i32_0 = arith.constant 0 : i32
    %c0_i32_1 = arith.constant 0 : i32
    return %arg0, %c0_i32, %c0_i32_0 : i32, i32, i32
  }
}

</mosaic_0001>

<bundles_post_ra>
// kernel: tpu_custom_call.1
= control target key start
LH: loop header
LB: loop body
LE: loop exit
PB: predicated region body
PF: predicated region fallthrough
CT: control target
= control target key end

     0   :  { %s1512_s0 = inlined_call_operand.hbm [shape: f32[2,8,32], index: 0, kind: input, shape index: {}]   ;;  %s1513_s1 = inlined_call_operand.hbm [shape: bf16[1,32,96], index: 1, kind: input, shape index: {}]   ;;  %s1514_s2 = inlined_call_operand.vmem [shape: f32[1,1,96], index: 2, kind: input, shape index: {}]   ;;  %s1515_s3 = inlined_call_operand.hbm [shape: bf16[1,32,32], index: 3, kind: input, shape index: {}]   ;;  %s1516_s4 = inlined_call_operand.vmem [shape: f32[1,32], index: 4, kind: input, shape index: {}]   ;;  %s1517_s5 = inlined_call_operand.vmem [shape: f32[1,32], index: 5, kind: input, shape index: {}]   ;;  %s1518_s6 = inlined_call_operand.vmem [shape: f32[1,32], index: 6, kind: input, shape index: {}]   ;;  %s1519_s7 = inlined_call_operand.hbm [shape: f32[2,8,32], index: 7, kind: output, shape index: {}]  }
   0x1   :  { %1520 = sst [smem:[#allocation13_spill]] %s1513_s1 }
   0x2   :  { %12 = vsyncpa [#allocation4], 0 }
   0x3   :  { %14 = vsyncpa [#allocation4 + $0x1], 0 }
   0x4   :  { %15 = vsyncpa [#allocation7], 0 }
   0x5   :  { %16 = vsyncpa [#allocation5], 0 }
   0x6   :  { %18 = vsyncpa [#allocation5 + $0x1], 0  ;;  %s1300_s24 = smov 0   ;;  %s1302_s25 = smov 0  }
   0x7   :  { %s1304_s26 = smov 0   ;;  %s1306_s27 = smov 0  }
   0x8   :  { %s1308_s28 = smov 0   ;;  %s1310_s29 = smov 0  }
   0x9 LB: > { %s891_s30 = sadd.s32 4294967295, %s1239_s29   ;;  %p893_p0 = scmp.ge.s32.totalorder %s1239_s29, 1  ;;  %s1239_s29 = sphi %s1310_s29, %s24_s29   ;;  %s1235_s28 = sphi %s1308_s28, %s1531_s28   ;;  %s1231_s27 = sphi %s1306_s27, %s1530_s27   ;;  %s1227_s26 = sphi %s1304_s26, %s1529_s26   ;;  %s1223_s25 = sphi %s1302_s25, %s1528_s25   ;;  %s1219_s24 = sphi %s1300_s24, %s1527_s24  }
   0xa   : > { %p1334_p1 = scmp.eq.s32.totalorder %s891_s30, 0  ;;  %p234_p2 = scmp.lt.s32.totalorder %s1239_s29, 3 }
   0xb   : > { %s1522_s1 = sld [smem:[#allocation13_spill]]  ;;  %s1241_s13 = smov [#allocation6]  }
   0xc   : > { %p1342_p3 = pnand %p893_p0, %p234_p2  ;;  %s250_s14 = sshll.u32 %s1241_s13, 4  ;;  %s251_s14 = int_to_ptr.vmem [resolvable:$true] %s250_s14 }
   0xd   : > { %p897_p6 = scmp.ge.s32.totalorder %s1239_s29, 2  ;;  %s271_s17 = sshll.u32 %s1515_s3, 4  ;;  %s272_s17 = int_to_ptr.hbm [resolvable:$true] %s271_s17 }
   0xe   : > { %p951_p4 = pneg %p1342_p3  ;;  %s1242_s18 = smov 64  }
   0xf   : > { %s1243_s19 = smov 4   ;;  %s1244_s20 = smov [#allocation8]  }
  0x10   : > { %p952_p5 = pnand %p951_p4, %p1334_p1  ;;  %s273_s21 = sshll.u32 %s1244_s20, 4  ;;  %s274_s21 = int_to_ptr.vmem [resolvable:$true] %s273_s21 }
  0x11   : > { %s248_s11 = sshll.u32 %s1522_s1, 4  ;;  %s36_s22 = sadd.s32 1, %s1235_s28  ;;  %s249_s11 = int_to_ptr.hbm [resolvable:$true] %s248_s11 }
  0x12   : > { %954 = dma.hbm_to_vmem [thread:$0]  (!%p952_p5), %s249_s11, 256, %s251_s14, [#allocation7], %s1242_s18, %s1242_s18, %s1243_s19  }
  0x13   : > { %957 = dma.hbm_to_vmem [thread:$0]  (!%p952_p5), %s272_s17, 256, %s274_s21, [#allocation7], %s1242_s18, %s1242_s18, %s1243_s19  }
  0x14   : > { %s892_s23 = sadd.s32 4294967294, %s1239_s29   ;;  %p38_p7 = scmp.ge.s32.totalorder %s36_s22, 2 }
  0x15   : > { %s43_s9 = sadd.s32 1, %s1227_s26  ;;  %p50_p8 = scmp.ne.s32.totalorder %s1227_s26, %s1223_s25 }
  0x16   : > { %s1533_s22 = smov (%p38_p7, %s36_s22), 0  ;;  %p51_p9 = scmp.eq.s32.totalorder %s1239_s29, 0 }
  0x17   : > { %p56_p10 = scmp.ne.s32.totalorder %s1223_s25, %s1219_s24  ;;  %s40_s10 = ssub.s32 %s1235_s28, %s1533_s22 }
  0x18   : > { %p221_p11 = scmp.eq.s32.totalorder %s891_s30, 1  ;;  %p41_p12 = scmp.eq.s32.totalorder %s40_s10, 0 }
  0x19   : > { %p1370_p13 = por %p1334_p1, %p56_p10  ;;  %p227_p2 = scmp.eq.s32.totalorder %s892_s23, 1 }
  0x1a   : > { %p1374_p0 = por %p221_p11, %p50_p8  ;;  %p52_p4 = por %p51_p9, %p50_p8 }
  0x1b   : > { %s1379_s14 = scalar_select %p41_p12, %s1227_s26, %s43_s9  }
  0x1c   : > { %p1381_p5 = por %p227_p2, %p56_p10  ;;  %s296_s16 = sand.u32 1, %s1227_s26  }
  0x1d   : > { %s899_s30 = sshll.u32 %s1235_s28, 3  ;;  %p968_p7 = scmp.lt.s32.totalorder %s1239_s29, 2 }
  0x1e   : > { %s898_s17 = sshll.u32 %s296_s16, 3  ;;  %s304_s20 = scalar_lea.hbm %s1512_s0, %s899_s30 }
  0x1f   : > { %s306_s21 = sshll.u32 %s304_s20, 4  ;;  %s300_s10 = scalar_lea.vmem [#allocation3], %s898_s17  ;;  %s307_s21 = int_to_ptr.hbm [resolvable:$true] %s306_s21 }
  0x20   : > { %s308_s1 = sshll.u32 %s300_s10, 4  ;;  %p959_p11 = pnand %p968_p7, %p52_p4  ;;  %s309_s1 = int_to_ptr.vmem [resolvable:$true] %s308_s1 }
  0x21   : > { %s297_s23 = scalar_lea.sflag [#allocation4], %s296_s16  ;;  %317 = sbr.rel (%p1342_p3) target bundleno = 1398 (0x576), region = 48 }
  0x22   : > { %961 = dma.hbm_to_vmem [thread:$0]  (!%p959_p11), %s307_s21, 128, %s309_s1, %s297_s23  }
  0x23   : > { %s1394_s9 = sand.u32 (!%p1342_p3), 1, %s1223_s25  }
  0x24   : > { %s901_s18 = sshll.u32 (!%p1342_p3), %s1394_s9, 3  ;;  %s320_s30 = scalar_lea.sflag (!%p1342_p3), [#allocation4], %s1394_s9 }
  0x25   : > { %s323_s17 = scalar_lea.vmem (!%p1342_p3), [#allocation3], %s901_s18 }
  0x26   : > { %1206 = dma.done.wait (%p1370_p13), %s320_s30, 128  }
  0x27   : > { %1208 = vsyncadd (%p1370_p13), %s320_s30, 4294967168 }
  0x28   : > { %1210 = dma.done.wait (%p1334_p1), [#allocation7], 512  }
  0x29   : > { %1212 = vsyncadd (%p1334_p1), [#allocation7], 4294966784  ;;  %v936_v0 = vld [vmem:[#allocation6 + $0x8] sm:$0xff]  ;;  %v1408_v1 = vld [vmem:[%s323_s17] sm:$0xff]  ;;  %vm378_vm0 = vcmask 257024   ;;  %vm401_vm1 = vcmask 261120  }
  0x2a   : > { %v377_v2 = vpack.c.bf16 %v1408_v1, %v1408_v1  ;;  %411 = vmatpush.bf16.msra.mxu0 %v936_v0  ;;  %v935_v3 = vld [vmem:[#allocation6] sm:$0xff]  ;;  %v1039_v5 = vld [vmem:[%s1514_s2] ss:$0 sm:$0xff]  ;;  %s1245_s8 = smov 104   ;;  %s1246_s11 = smov 120   ;;  %vm424_vm2 = vcmask 64512  }
  0x2b   : > { %s1247_s16 = smov 96   ;;  %s1248_s19 = smov 80   ;;  %vm462_vm3 = vcmask 1043456   ;;  %vm663_vm4 = vcmask 130048   ;;  %vm665_vm5 = vcmask 195584  }
  0x2c   : > { %379 = vst.msk [vmem:[#allocation2] sm:$0xf] %vm378_vm0, %v377_v2  ;;  %s1249_s20 = smov 72   ;;  %s1250_s21 = smov 88  }
  0x2d   : > { %s1251_s10 = smov 112   ;;  %s1252_s23 = smov 64  }
  0x2e   : > { %412 = vmatpush.bf16.msra.mxu0 %v935_v3  ;;  %s1253_s30 = smov 40   ;;  %s1254_s17 = smov 56  }
  0x2f   : > { %s1255_s1 = smov 48   ;;  %s1256_s12 = smov 8  }
  0x33   : > { %v380_v4 = vld [vmem:[#allocation2] sm:$0xf] }
  0x34   : > { %913 = vmatmul.msk.bf16.vlgmr.msra.gmra.mxu0 %vm401_vm1, %v380_v4 }
  0xb1   : > { %v414_v6 = vpop.f32.mrf.mxu0 }
  0xb2   : > { %v415_v7 = vadd.f32 %v1039_v5, %v414_v6 }
  0xb4   : > { %v418_v8 = vpack.c.bf16 %v415_v7, %v415_v7 }
  0xb6   : > { %v420_v9 = vunpack.c.l.b16 %v418_v8  ;;  %593 = vrot.lane.b32.xlu2 %v418_v8, %s1245_s8  ;;  %479 = vrot.lane.b32.xlu1 %v418_v8, %s1246_s11  ;;  %s1257_s8 = smov 16   ;;  %s1258_s11 = smov 24  }
  0xb8   : > { %v1416_v10 = vpack.c.b16 %v420_v9, %v420_v9 }
  0xb9   : > { %v416_v11 = vpop.f32.mrf.mxu0 }
  0xba   : > { %422 = vrot.lane.b32.xlu0 %v1416_v10, %s1247_s16  ;;  %s1454_s16 = scalar_lea.vmem [#allocation9], %s901_s18  ;;  %s932_s18 = sshll.u32 %s1231_s27, 3 }
  0xbb   : > { %s775_s27 = sshll.u32 %s1454_s16, 4  ;;  %s776_s27 = int_to_ptr.vmem [resolvable:$true] %s775_s27 }
  0xbe   : > { %538 = vrot.lane.b32.xlu2 %v1416_v10, %s1248_s19  ;;  %595 = vrot.lane.b32.xlu1 %v1416_v10, %s1249_s20 }
  0xc2   : > { %481 = vrot.lane.b32.xlu0 %v1416_v10, %s1250_s21 }
  0xca   : > { %536 = vrot.lane.b32.xlu0 %v418_v8, %s1251_s10  ;;  %s1173_s10 = scalar_lea.hbm %s1519_s7, 16 }
 0x110   : > { %v594_v12 = vpop.permute.xlu2 %593 }
 0x118   : > { %v539_v13 = vpop.permute.xlu2 %538 }
 0x119   : > { %v544_v14 = vsel %vm424_vm2, %v539_v13, 0 }
 0x11a   : > { %553 = vmatpush.bf16.xpose.msrb.mxu0 %v544_v14 }
 0x128   : > { %v480_v15 = vpop.permute.xlu1 %479 }
 0x12c   : > { %v423_v16 = vpop.permute.xlu0 %422 }
 0x12d   : > { %v429_v17 = vsel %vm424_vm2, %v423_v16, 0 }
 0x12e   : > { %438 = vmatpush.bf16.xpose.msra.mxu1 %v429_v17 }
 0x130   : > { %v596_v18 = vpop.permute.xlu1 %595 }
 0x131   : > { %v601_v21 = vsel %vm424_vm2, %v596_v18, 0 }
 0x134   : > { %v482_v19 = vpop.permute.xlu0 %481 }
 0x135   : > { %914 = vmatmul.msk.bf16.vlgmr.msra.gmra.mxu1 %vm424_vm2, %v418_v8  ;;  %v487_v20 = vsel %vm424_vm2, %v482_v19, 0 }
 0x136   : > { %496 = vmatpush.bf16.xpose.msra.mxu3 %v487_v20 }
 0x13c   : > { %v537_v22 = vpop.permute.xlu0 %536 }
 0x13d   : > { %916 = vmatmul.msk.bf16.vlgmr.msra.gmra.mxu3 %vm424_vm2, %v480_v15  ;;  %918 = vmatmul.msk.bf16.vlgmr.msrb.gmra.mxu0 %vm424_vm2, %v537_v22 }
 0x13e   : > { %610 = vmatpush.bf16.xpose.msrb.mxu3 %v601_v21 }
 0x14d   : > { %920 = vmatmul.msk.bf16.vlgmr.msrb.gmra.mxu3 %vm424_vm2, %v594_v12 }
 0x1b2   : > { %v440_v23 = vpop.f32.mrf.mxu1 }
 0x1b3   : > { %v444_v24 = vmul.f32 0.35355338, %v440_v23 }
 0x1b5   : > { %v445_v25 = vsel %vm424_vm2, %v444_v24, -inf }
 0x1b6   : > { %446 = vmax.xlane.f32.xlu1 %v445_v25 }
 0x1ba   : > { %v442_v26 = vpop.f32.mrf.mxu1  ;;  %v555_v27 = vpop.f32.mrf.mxu0 }
 0x1bb   : > { %v559_v32 = vmul.f32 0.35355338, %v555_v27 }
 0x1bd   : > { %v560_v34 = vsel %vm424_vm2, %v559_v32, -inf }
 0x1c0   : > { %v498_v28 = vpop.f32.mrf.mxu3 }
 0x1c1   : > { %v502_v29 = vmul.f32 0.35355338, %v498_v28  ;;  %v938_v28 = vld [vmem:[#allocation8 + $0x8] sm:$0xff] }
 0x1c2   : > { %v557_v30 = vpop.f32.mrf.mxu0  ;;  %693 = vmatpush.bf16.msra.mxu0 %v938_v28 }
 0x1c3   : > { %v503_v31 = vsel %vm424_vm2, %v502_v29, -inf }
 0x1c4   : > { %504 = vmax.xlane.f32.xlu2 %v503_v31 }
 0x1c8   : > { %v500_v33 = vpop.f32.mrf.mxu3 }
 0x1cc   : > { %561 = vmax.xlane.f32.xlu2 %v560_v34 }
 0x1d0   : > { %v612_v35 = vpop.f32.mrf.mxu3 }
 0x1d1   : > { %v616_v36 = vmul.f32 0.35355338, %v612_v35 }
 0x1d3   : > { %v617_v37 = vsel %vm424_vm2, %v616_v36, -inf }
 0x1d4   : > { %618 = vmax.xlane.f32.xlu0 %v617_v37 }
 0x1d8   : > { %v614_v38 = vpop.f32.mrf.mxu3 }
 0x1d9   : > { %v1040_v38 = vld [vmem:[%s1516_s4] ss:$0 sm:$0xff] }
 0x1e4   : > { %457 = vrot.lane.b32.xlu2 %v1416_v10, %s1252_s23 }
 0x1ec   : > { %629 = vrot.lane.b32.xlu2 %v1416_v10, %s1253_s30 }
 0x229   : > { %v447_v39 = vpop.xlane.xlu1 %446 }
 0x22a   : > { %v448_v40 = vsub.f32 %v444_v24, %v447_v39 }
 0x22c   : > { %v449_v41 = vmul.f32 1.442695, %v448_v40 }
 0x22e   : > { %1043 = vpow2.f32 %v449_v41 }
 0x234   : > { %v1044_v42 = vpop.eup %1043 }
 0x235   : > { %v451_v43 = vsel %vm424_vm2, %v1044_v42, 0.0 }
 0x236   : > { %452 = vadd.xlane.f32.xlu1 %v451_v43 }
 0x237   : > { %v505_v44 = vpop.xlane.xlu2 %504 }
 0x238   : > { %v506_v47 = vsub.f32 %v502_v29, %v505_v44  ;;  %v937_v29 = vld [vmem:[#allocation8] sm:$0xff]  ;;  %v1259_v44 = vmov 32.0  }
 0x239   : > { %694 = vmatpush.bf16.msra.mxu0 %v937_v29 }
 0x23a   : > { %v507_v49 = vmul.f32 1.442695, %v506_v47 }
 0x23f   : > { %v562_v45 = vpop.xlane.xlu2 %561 }
 0x240   : > { %v563_v46 = vsub.f32 %v559_v32, %v562_v45 }
 0x242   : > { %v564_v48 = vmul.f32 1.442695, %v563_v46 }
 0x244   : > { %1045 = vpow2.f32 %v564_v48 }
 0x245   : > { %1047 = vpow2.f32 %v507_v49 }
 0x247   : > { %v458_v50 = vpop.permute.xlu2 %457  ;;  %v619_v51 = vpop.xlane.xlu0 %618 }
 0x248   : > { %v464_v52 = vsel %vm462_vm3, %v458_v50, 0  ;;  %v620_v54 = vsub.f32 %v616_v36, %v619_v51 }
 0x249   : > { %473 = vmatpush.bf16.msra.mxu2 %v464_v52 }
 0x24a   : > { %v1046_v53 = vpop.eup %1045  ;;  %v621_v56 = vmul.f32 1.442695, %v620_v54 }
 0x24b   : > { %v566_v55 = vsel %vm424_vm2, %v1046_v53, 0.0  ;;  %v1048_v57 = vpop.eup %1047 }
 0x24c   : > { %567 = vadd.xlane.f32.xlu0 %v566_v55  ;;  %1049 = vpow2.f32 %v621_v56  ;;  %v509_v58 = vsel %vm424_vm2, %v1048_v57, 0.0 }
 0x24f   : > { %515 = vrot.lane.b32.xlu1 %v1416_v10, %s1254_s17  ;;  %v630_v3 = vpop.permute.xlu2 %629  ;;  %s773_s17 = scalar_lea.hbm %s1519_s7, %s932_s18 }
 0x250   : > { %v635_v6 = vsel %vm462_vm3, %v630_v3, 0  ;;  %v1042_v3 = vld [vmem:[%s1518_s6] ss:$0 sm:$0xff] }
 0x252   : > { %v1050_v59 = vpop.eup %1049 }
 0x253   : > { %v623_v60 = vsel %vm424_vm2, %v1050_v59, 0.0 }
 0x254   : > { %510 = vadd.xlane.f32.xlu0 %v509_v58 }
 0x25c   : > { %624 = vadd.xlane.f32.xlu0 %v623_v60 }
 0x270   : > { %572 = vrot.lane.b32.xlu0 %v1416_v10, %s1255_s1 }
 0x2a9   : > { %v453_v61 = vpop.xlane.xlu1 %452 }
 0x2aa   : > { %1051 = vrcp.f32 %v453_v61 }
 0x2b0   : > { %v1052_v62 = vpop.eup %1051 }
 0x2b1   : > { %v455_v63 = vmul.f32 %v1052_v62, %v1044_v42 }
 0x2b3   : > { %v456_v0 = vpack.c.bf16 %v455_v63, %v455_v63 }
 0x2b5   : > { %915 = vmatmul.msk.bf16.vlgmr.msra.gmra.mxu2 %vm424_vm2, %v456_v0  ;;  %v1041_v0 = vld [vmem:[%s1517_s5] ss:$0 sm:$0xff] }
 0x2bf   : > { %v568_v2 = vpop.xlane.xlu0 %567 }
 0x2c1   : > { %v516_v4 = vpop.permute.xlu1 %515 }
 0x2c2   : > { %v521_v5 = vsel %vm462_vm3, %v516_v4, 0 }
 0x2c3   : > { %530 = vmatpush.bf16.msrb.mxu2 %v521_v5 }
 0x2c7   : > { %644 = vmatpush.bf16.msra.mxu2 %v635_v6  ;;  %v511_v7 = vpop.xlane.xlu0 %510 }
 0x2c8   : > { %1053 = vrcp.f32 %v511_v7 }
 0x2ce   : > { %v1054_v8 = vpop.eup %1053 }
 0x2cf   : > { %v513_v9 = vmul.f32 %v1054_v8, %v1048_v57  ;;  %v625_v10 = vpop.xlane.xlu0 %624 }
 0x2d0   : > { %1055 = vrcp.f32 %v625_v10 }
 0x2d1   : > { %v514_v11 = vpack.c.bf16 %v513_v9, %v513_v9  ;;  %1057 = vrcp.f32 %v568_v2 }
 0x2d2   : > { %1059 = vrcp.f32 %v1259_v44 }
 0x2d3   : > { %917 = vmatmul.msk.bf16.vlgmr.msrb.gmra.mxu2 %vm424_vm2, %v514_v11 }
 0x2d6   : > { %v1056_v12 = vpop.eup %1055 }
 0x2d7   : > { %v627_v13 = vmul.f32 %v1056_v12, %v1050_v59  ;;  %v1058_v14 = vpop.eup %1057 }
 0x2d8   : > { %v570_v15 = vmul.f32 %v1058_v14, %v1046_v53  ;;  %v1060_v45 = vpop.eup %1059 }
 0x2d9   : > { %v628_v16 = vpack.c.bf16 %v627_v13, %v627_v13  ;;  %v726_v46 = vmul.f32 32.0, %v1060_v45  ;;  %vm730_vm6 = vweird.f32 %v1060_v45 }
 0x2da   : > { %v571_v19 = vpack.c.bf16 %v570_v15, %v570_v15 }
 0x2db   : > { %v727_v47 = vsub.f32 1.0, %v726_v46 }
 0x2dd   : > { %v728_v48 = vmul.f32 %v1060_v45, %v727_v47 }
 0x2df   : > { %v729_v49 = vadd.f32 %v1060_v45, %v728_v48 }
 0x2e1   : > { %v731_v50 = vsel %vm730_vm6, %v1060_v45, %v729_v49 }
 0x2e2   : > { %v573_v17 = vpop.permute.xlu0 %572 }
 0x2e3   : > { %921 = vmatmul.msk.bf16.vlgmr.msra.gmra.mxu2 %vm424_vm2, %v628_v16  ;;  %v578_v18 = vsel %vm462_vm3, %v573_v17, 0 }
 0x2e4   : > { %587 = vmatpush.bf16.msrb.mxu1 %v578_v18 }
 0x2e7   : > { %919 = vmatmul.msk.bf16.vlgmr.msrb.gmra.mxu1 %vm424_vm2, %v571_v19 }
 0x338   : > { %v475_v20 = vpop.f32.mrf.mxu2 }
 0x340   : > { %v477_v21 = vpop.f32.mrf.mxu2 }
 0x356   : > { %v532_v22 = vpop.f32.mrf.mxu2 }
 0x357   : > { %651 = vrot.lane.b32.xlu1 %v532_v22, %s1256_s12 }
 0x35e   : > { %v534_v23 = vpop.f32.mrf.mxu2 }
 0x364   : > { %v589_v24 = vpop.f32.mrf.mxu1 }
 0x365   : > { %655 = vrot.lane.b32.xlu2 %v589_v24, %s1257_s8  ;;  %s777_s8 = sshll.u32 %s773_s17, 4  ;;  %s778_s8 = int_to_ptr.hbm [resolvable:$true] %s777_s8 }
 0x366   : > { %v646_v25 = vpop.f32.mrf.mxu2  ;;  %s1167_s19 = sshra.s32 %s778_s8, 4  ;;  %s1168_s19 = int_to_ptr.hbm [resolvable:$true] %s1167_s19 }
 0x367   : > { %659 = vrot.lane.b32.xlu1 %v646_v25, %s1258_s11  ;;  %s763_s11 = scalar_lea.sflag [#allocation5], %s1394_s9  ;;  %s1169_s20 = scalar_lea.hbm %s1168_s19, 8 }
 0x368   : > { %p1170_p1 = scmp.ne.s32.totalorder %s1168_s19, %s1169_s20  ;;  %p1174_p9 = scmp.lt.s32.totalorder %s1168_s19, %s1519_s7 }
 0x369   : > { %p1175_p10 = scmp.lt.s32.totalorder %s1173_s10, %s1169_s20 }
 0x36a   : > { %p1171_p3 = pnand %p1170_p1, %p1374_p0 }
 0x36b   : > { %p1176_p12 = por %p1175_p10, %p1174_p9 }
 0x36c   : > { %v591_v26 = vpop.f32.mrf.mxu1  ;;  %p1172_p8 = pneg %p1171_p3 }
 0x36e   : > { %v648_v27 = vpop.f32.mrf.mxu2  ;;  %p1177_p13 = pnand %p1176_p12, %p1172_p8 }
 0x3bf   : > { %v656_v32 = vpop.permute.xlu2 %655 }
 0x3c9   : > { %v652_v30 = vpop.permute.xlu1 %651 }
 0x3ca   : > { %v662_v31 = vsel %vm424_vm2, %v475_v20, %v652_v30 }
 0x3cb   : > { %v664_v34 = vsel %vm663_vm4, %v662_v31, %v656_v32 }
 0x3d9   : > { %v660_v33 = vpop.permute.xlu1 %659 }
 0x3da   : > { %v666_v35 = vsel %vm665_vm5, %v664_v34, %v660_v33 }
 0x3db   : > { %v667_v36 = vpack.c.bf16 %v666_v35, %v666_v35 }
 0x3dd   : > { %930 = vmatmul.msk.bf16.vlgmr.msra.gmra.mxu0 %vm401_vm1, %v667_v36 }
 0x45a   : > { %v696_v37 = vpop.f32.mrf.mxu0 }
 0x45b   : > { %703 = vst.msk [vmem:[%s1454_s16] sm:$0xff] %vm401_vm1, %v696_v37 }
 0x462   : > { %v698_v39 = vpop.f32.mrf.mxu0  ;;  %v715_v40 = vld [vmem:[%s1454_s16] sm:$0xff] }
 0x463   : > { %v720_v41 = vadd.f32 %v1040_v38, %v715_v40 }
 0x465   : > { %v721_v42 = vadd.f32 %v720_v41, %v1408_v1 }
 0x467   : > { %v722_v43 = vsel %vm401_vm1, %v721_v42, 0.0 }
 0x468   : > { %723 = vadd.xlane.f32.xlu2 %v722_v43 }
 0x4db   : > { %v724_v51 = vpop.xlane.xlu2 %723 }
 0x4dc   : > { %v732_v52 = vmul.f32 %v731_v50, %v724_v51 }
 0x4de   : > { %v733_v53 = vsub.f32 %v721_v42, %v732_v52 }
 0x4e0   : > { %v734_v54 = vmul.f32 %v733_v53, %v733_v53 }
 0x4e2   : > { %v735_v55 = vsel %vm401_vm1, %v734_v54, 0.0 }
 0x4e3   : > { %736 = vadd.xlane.f32.xlu1 %v735_v55 }
 0x556   : > { %v737_v1 = vpop.xlane.xlu1 %736 }
 0x557   : > { %v738_v56 = vmul.f32 %v737_v1, %v731_v50 }
 0x559   : > { %v739_v57 = vadd.f32 1e-12, %v738_v56 }
 0x55b   : > { %1061 = vrsqrt.f32 %v739_v57  ;;  %vm746_vm8 = vweird.f32 %v739_v57 }
 0x561   : > { %v1062_v58 = vpop.eup %1061 }
 0x562   : > { %v741_v59 = vmul.f32 %v1062_v58, %v739_v57  ;;  %vm747_vm7 = vweird.f32 %v1062_v58 }
 0x563   : > { %vm748_vm9 = vmor %vm746_vm8, %vm747_vm7 }
 0x564   : > { %v742_v60 = vmul.f32 %v1062_v58, %v741_v59 }
 0x566   : > { %v743_v61 = vmul.f32 0.5, %v742_v60 }
 0x568   : > { %v744_v62 = vsub.f32 1.5, %v743_v61 }
 0x56a   : > { %v745_v63 = vmul.f32 %v1062_v58, %v744_v62 }
 0x56c   : > { %v749_v2 = vsel %vm748_vm9, %v1062_v58, %v745_v63 }
 0x56d   : > { %v750_v4 = vmul.f32 %v749_v2, %v733_v53 }
 0x56f   : > { %v755_v5 = vmul.f32 %v1041_v0, %v750_v4 }
 0x571   : > { %v760_v6 = vadd.f32 %v1042_v3, %v755_v5 }
 0x573   : > { %761 = vst.msk [vmem:[%s1454_s16] sm:$0xff] %vm401_vm1, %v760_v6 }
 0x574   : > { %1180 = shalt.err (!%p1177_p13)
}
 0x575   : > { %949 = dma.vmem_to_hbm [thread:$0]  (%p1374_p0), %s776_s27, 128, %s778_s8, %s763_s11  }
 0x576 PF: > { %s789_s9 = sand.u32 1, %s1219_s24   ;;  %p963_p2 = pnand %p897_p6, %p1381_p5 }
 0x577   : > { %s790_s16 = scalar_lea.sflag [#allocation5], %s789_s9 }
 0x578   : > { %p964_p4 = pneg %p963_p2 }
 0x57a   : > { %1214 = dma.done.wait (%p964_p4), %s790_s16, 128  }
 0x57b   : > { %1216 = vsyncadd (%p964_p4), %s790_s16, 4294967168  ;;  %s24_s29 = sadd.s32 1, %s1239_s29   ;;  %s1527_s24 = smov %s1223_s25 }
 0x57c   : > { %p21_p7 = scmp.ge.s32.totalorder %s24_s29, 4   ;;  %s1528_s25 = smov %s1227_s26 }
 0x57d   : > { %s1529_s26 = smov %s1379_s14  ;;  %s1530_s27 = smov %s1235_s28 }
 0x57e   : > { %s1531_s28 = smov %s1533_s22  ;;  %23 = sbr.rel (!%p21_p7) target bundleno = 9 (0x9), region = 122 }
 0x583   :  { %796 = vsyncpa [#allocation4], 1 }
 0x584   :  { %798 = vsyncpa [#allocation4 + $0x1], 1 }
 0x585   :  { %799 = vsyncpa [#allocation7], 1 }
 0x586   :  { %800 = vsyncpa [#allocation5], 1 }
 0x587   :  { %802 = vsyncpa [#allocation5 + $0x1], 1 }

</bundles_post_ra>
